<compile_context>
chip_gen: v6e
topology: v6e:2x2x1
jax: 0.10.0
libtpu: 0.0.40
codegen_flags: <defaults>
</compile_context>

<pallas_src>
import functools

import jax
import jax.numpy as jnp
from jax import lax
from jax.experimental import pallas as pl
from jax.experimental.pallas import tpu as pltpu


_TARGET_TILE_BYTES = 2 * 1024 * 1024  # ~2 MiB per in/out buffer: double-buffered
                                      # in+out plus f32 temporaries stays well
                                      # under v5e's 16 MiB scoped VMEM default
                                      # (and v6e/v7x limits).


def _round_up(v, m):
    return ((v + m - 1) // m) * m


def _round_down(v, m):
    return (v // m) * m


def _sublane_multiple(dtype):
    n = jnp.dtype(dtype).itemsize
    if n >= 4:
        return 8
    if n == 2:
        return 16
    return 32


# ----------------------------------------------------------------------------
# Kernel: L_p-normalize over `axis` of the current tile (reduce dim is whole).
# ----------------------------------------------------------------------------
def _normalize_kernel(x_ref, o_ref, *, power, axis):
    x = x_ref[...].astype(jnp.float32)          # compute in f32
    if power == 2:
        s = jnp.sum(x * x, axis=axis, keepdims=True)       # XLU reduce
        out = x * lax.rsqrt(s)                              # EUP rsqrt, no divide
    else:
        s = jnp.sum(x ** power, axis=axis, keepdims=True)
        out = x * (s ** (-1.0 / power))                     # one pow/row + VPU mul
    o_ref[...] = out.astype(o_ref.dtype)


# ----------------------------------------------------------------------------
# 2-D path: (M, D), normalize each row over D (lanes).
# ----------------------------------------------------------------------------
def _normalize_rows(x2d, power):
    M, D = x2d.shape
    dtype = x2d.dtype
    sub = _sublane_multiple(dtype)
    itemsize = jnp.dtype(dtype).itemsize

    if M <= sub:
        tm = M                                   # block dim == full dim (legal)
    else:
        row_bytes = max(1, D * itemsize)
        # Byte-targeted tile (~2 MiB per buffer) ...
        tm = _round_down(max(sub, _TARGET_TILE_BYTES // row_bytes), sub)
        # ... but also aim for >= ~8 grid steps (v7x megacore + pipelining).
        tm = min(tm, max(sub, _round_up(pl.cdiv(M, 8), sub)))
        # Clean (in-bounds) leading blocks; last block may be a boundary block
        # whose OOB rows are dropped on store.
        tm = max(sub, min(tm, _round_down(M, sub)))

    grid = (pl.cdiv(M, tm),)
    kernel = functools.partial(_normalize_kernel, power=power, axis=-1)
    return pl.pallas_call(
        kernel,
        out_shape=jax.ShapeDtypeStruct((M, D), dtype),
        grid=grid,
        in_specs=[pl.BlockSpec((tm, D), lambda i: (i, 0))],
        out_specs=pl.BlockSpec((tm, D), lambda i: (i, 0)),
        compiler_params=pltpu.CompilerParams(
            dimension_semantics=("parallel",)),
    )(x2d)


# ----------------------------------------------------------------------------
# N-D path: (B, C, S), normalize over C (sublanes); S tiled on lanes.
# ----------------------------------------------------------------------------
def _normalize_channels(x3d, power):
    B, C, S = x3d.shape
    dtype = x3d.dtype
    itemsize = jnp.dtype(dtype).itemsize

    if S <= 128:
        ts = S                                   # block dim == full dim (legal)
    else:
        col_bytes = max(1, C * itemsize)
        # Byte-targeted spatial tile (~2 MiB per buffer), lane-aligned ...
        ts = _round_down(max(128, _TARGET_TILE_BYTES // col_bytes), 128)
        # ... and enough total grid steps (B * spatial steps >= ~8).
        want_steps = max(1, pl.cdiv(8, B))
        ts = min(ts, max(128, _round_up(pl.cdiv(S, want_steps), 128)))
        # Clean leading blocks; boundary block's OOB lanes are dropped on store
        # (each lane's channel-reduction is independent, so no contamination).
        ts = max(128, min(ts, _round_down(S, 128)))

    grid = (B, pl.cdiv(S, ts))
    kernel = functools.partial(_normalize_kernel, power=power, axis=-2)
    return pl.pallas_call(
        kernel,
        out_shape=jax.ShapeDtypeStruct((B, C, S), dtype),
        grid=grid,
        in_specs=[pl.BlockSpec((1, C, ts), lambda b, s: (b, 0, s))],
        out_specs=pl.BlockSpec((1, C, ts), lambda b, s: (b, 0, s)),
        compiler_params=pltpu.CompilerParams(
            dimension_semantics=("parallel", "parallel")),
    )(x3d)


# ----------------------------------------------------------------------------
def normalize(x, power=2):
    """PyTorch Normalize.forward: divide by the L_p norm over dim=1."""
    if x.ndim < 2:
        raise ValueError("Normalize expects at least a 2-D input (dim=1 reduce).")
    if x.ndim == 2:
        return _normalize_rows(x, power)

    B, C = x.shape[0], x.shape[1]
    S = 1
    for d in x.shape[2:]:
        S *= int(d)
    if S == 1:
        # (B, C, 1, ..., 1): just a row-wise normalize over C.
        return _normalize_rows(x.reshape(B, C), power).reshape(x.shape)
    # Row-major reshape is free (no data movement); channels stay on dim 1.
    out3 = _normalize_channels(x.reshape(B, C, S), power)
    return out3.reshape(x.shape)


# ----------------------------------------------------------------------------
def _reference(x, power=2):
    xf = x.astype(jnp.float32)
    norm = jnp.sum(xf ** power, axis=1, keepdims=True) ** (1.0 / power)
    return (xf / norm).astype(x.dtype)


if __name__ == "__main__":
    key = jax.random.PRNGKey(0)
    k1, k2, k3, k4 = jax.random.split(key, 4)

    # Case 1: feature-map style input (B, C, H, W) -> normalize over channels.
    x4d = jax.random.normal(k1, (2, 4, 16, 16), jnp.float32)
    out4d = jax.block_until_ready(normalize(x4d, power=2))
    assert out4d.shape == x4d.shape and out4d.dtype == x4d.dtype
    assert bool(jnp.all(jnp.isfinite(out4d)))
    assert bool(jnp.allclose(out4d, _reference(x4d), atol=1e-5, rtol=1e-5))

    # Case 2: embedding-style input (B, D) -> normalize over features (the
    # typical use of Normalize in AGW on pooled features).
    x2d = jax.random.normal(k2, (2, 512), jnp.float32)
    out2d = jax.block_until_ready(normalize(x2d, power=2))
    assert out2d.shape == x2d.shape and out2d.dtype == x2d.dtype
    assert bool(jnp.all(jnp.isfinite(out2d)))
    assert bool(jnp.allclose(out2d, _reference(x2d), atol=1e-5, rtol=1e-5))
    assert bool(jnp.allclose(jnp.linalg.norm(out2d, axis=1), 1.0, atol=1e-4))

    # Case 3: unaligned rows / features -> exercises the boundary-block path
    # (no padding, OOB rows dropped on store, D == full dim on lanes).
    x_odd = jax.random.normal(k3, (37, 200), jnp.float32)
    out_odd = jax.block_until_ready(normalize(x_odd, power=2))
    assert bool(jnp.allclose(out_odd, _reference(x_odd), atol=1e-5, rtol=1e-5))

    # Case 4: unaligned channels / spatial dims on the N-D path.
    x_odd4 = jax.random.normal(k4, (2, 3, 10, 13), jnp.float32)
    out_odd4 = jax.block_until_ready(normalize(x_odd4, power=2))
    assert bool(jnp.allclose(out_odd4, _reference(x_odd4), atol=1e-5, rtol=1e-5))

    print("KERNEL_OK")
</pallas_src>

<mosaic_0001>
module attributes {stable_mosaic.version = 11 : i64} {
  func.func @_normalize_kernel(%arg0: i32, %arg1: i32, %arg2: memref<1x4x128xf32, #tpu.memory_space<vmem>>, %arg3: memref<1x4x128xf32, #tpu.memory_space<vmem>>) attributes {dimension_semantics = [#tpu.dimension_semantics<parallel>, #tpu.dimension_semantics<parallel>], iteration_bounds = array<i64: 2, 2>, scalar_prefetch = 0 : i64, scratch_operands = 0 : i64, tpu.core_type = #tpu.core_type<tc>, window_params = [{transform_indices = @transform_0, window_bounds = array<i64: 1, 4, 128>}, {transform_indices = @transform_1, window_bounds = array<i64: 1, 4, 128>}]} {
    %c0 = arith.constant 0 : index
    %c0_0 = arith.constant 0 : index
    %c0_1 = arith.constant 0 : index
    %0 = vector.load %arg2[%c0, %c0_0, %c0_1] : memref<1x4x128xf32, #tpu.memory_space<vmem>>, vector<1x4x128xf32>
    %1 = arith.mulf %0, %0 : vector<1x4x128xf32>
    %cst = arith.constant dense<0.000000e+00> : vector<1x128xf32>
    %2 = vector.multi_reduction <add>, %1, %cst [1] : vector<1x4x128xf32> to vector<1x128xf32>
    %3 = vector.shape_cast %2 : vector<1x128xf32> to vector<1x1x128xf32>
    %4 = math.rsqrt %3 : vector<1x1x128xf32>
    %5 = vector.broadcast %4 : vector<1x1x128xf32> to vector<1x4x128xf32>
    %6 = arith.mulf %0, %5 : vector<1x4x128xf32>
    %c0_2 = arith.constant 0 : index
    %c0_3 = arith.constant 0 : index
    %c0_4 = arith.constant 0 : index
    %7 = vector.load %arg3[%c0_2, %c0_3, %c0_4] : memref<1x4x128xf32, #tpu.memory_space<vmem>>, vector<1x4x128xf32>
    tpu.vector_store %arg3[%c0_2, %c0_3, %c0_4], %6 {strides = array<i32>} : memref<1x4x128xf32, #tpu.memory_space<vmem>>, vector<1x4x128xf32>,
    return
  }
  func.func @transform_0(%arg0: i32, %arg1: i32) -> (i32, i32, i32) {
    %c0_i32 = arith.constant 0 : i32
    %c0_i32_0 = arith.constant 0 : i32
    return %arg0, %c0_i32, %arg1 : i32, i32, i32
  }
  func.func @transform_1(%arg0: i32, %arg1: i32) -> (i32, i32, i32) {
    %c0_i32 = arith.constant 0 : i32
    %c0_i32_0 = arith.constant 0 : i32
    return %arg0, %c0_i32, %arg1 : i32, i32, i32
  }
}

</mosaic_0001>

<bundles_post_ra>
// kernel: tpu_custom_call.1
= control target key start
LH: loop header
LB: loop body
LE: loop exit
PB: predicated region body
PF: predicated region fallthrough
CT: control target
= control target key end

     0   :  { %6 = vsyncpa [#allocation3], 0  ;;  %s653_s0 = inlined_call_operand.hbm [shape: f32[2,4,256], index: 0, kind: input, shape index: {}]   ;;  %s654_s1 = inlined_call_operand.hbm [shape: f32[2,4,256], index: 1, kind: output, shape index: {}]  }
   0x1   :  { %8 = vsyncpa [#allocation3 + $0x1], 0 }
   0x2   :  { %9 = vsyncpa [#allocation4], 0 }
   0x3   :  { %11 = vsyncpa [#allocation4 + $0x1], 0  ;;  %s497_s6 = smov 0   ;;  %s499_s7 = smov 0  }
   0x4   :  { %s501_s8 = smov 0   ;;  %s503_s9 = smov 0  }
   0x5   :  { %s505_s10 = smov 0   ;;  %s507_s11 = smov 0  }
   0x6   :  { %s509_s12 = smov 0   ;;  %s511_s13 = smov 0  }
   0x7 LB: > { %s264_s14 = sadd.s32 4294967295, %s483_s13   ;;  %s265_s15 = sadd.s32 4294967294, %s483_s13   ;;  %s483_s13 = sphi %s511_s13, %s17_s13   ;;  %s479_s12 = sphi %s509_s12, %s667_s12   ;;  %s475_s11 = sphi %s507_s11, %s666_s11   ;;  %s471_s10 = sphi %s505_s10, %s665_s10   ;;  %s467_s9 = sphi %s503_s9, %s664_s9   ;;  %s463_s8 = sphi %s501_s8, %s663_s8   ;;  %s459_s7 = sphi %s499_s7, %s662_s7   ;;  %s455_s6 = sphi %s497_s6, %s661_s6  }
   0x8   : > { %s26_s16 = sadd.s32 1, %s475_s11  ;;  %s29_s17 = sadd.s32 1, %s479_s12 }
   0x9   : > { %p27_p0 = scmp.ge.s32.totalorder %s26_s16, 2  ;;  %s38_s18 = sadd.s32 1, %s463_s8 }
   0xa   : > { %p45_p1 = scmp.ne.s32.totalorder %s463_s8, %s459_s7  ;;  %p46_p2 = scmp.eq.s32.totalorder %s483_s13, 0 }
   0xb   : > { %s669_s16 = smov (%p27_p0, %s26_s16), 0  ;;  %s671_s17 = smov (!%p27_p0, %s29_s17), %s479_s12 }
   0xc   : > { %s34_s19 = ssub.s32 %s475_s11, %s669_s16  ;;  %p550_p3 = por %p46_p2, %p45_p1 }
   0xd   : > { %p31_p4 = scmp.ge.s32.totalorder %s671_s17, 2  ;;  %p51_p5 = scmp.ne.s32.totalorder %s459_s7, %s455_s6 }
   0xe   : > { %p52_p6 = scmp.eq.s32.totalorder %s264_s14, 0  ;;  %p77_p7 = scmp.eq.s32.totalorder %s264_s14, 3 }
   0xf   : > { %s673_s17 = smov (%p31_p4, %s671_s17), 0  ;;  %p83_p10 = scmp.eq.s32.totalorder %s265_s15, 3 }
  0x10   : > { %p558_p8 = por %p52_p6, %p51_p5  ;;  %p562_p9 = por %p77_p7, %p45_p1 }
  0x11   : > { %s33_s23 = ssub.s32 %s479_s12, %s673_s17  ;;  %p568_p12 = por %p83_p10, %p51_p5 }
  0x12   : > { %s35_s24 = sor.u32 %s34_s19, %s33_s23  ;;  %p291_p13 = scmp.lt.s32.totalorder %s483_s13, 4 }
  0x13   : > { %p36_p11 = scmp.eq.s32.totalorder %s35_s24, 0  ;;  %s103_s26 = sand.u32 1, %s463_s8  }
  0x14   : > { %s658_s25 = scalar_select %p568_p12, 1, 0 }
  0x15   : > { %s575_s27 = scalar_select %p36_p11, %s463_s8, %s38_s18  }
  0x16   : > { %s268_s28 = sshll.u32 %s103_s26, 2  ;;  %s269_s29 = sshll.u32 %s479_s12, 1 }
  0x17   : > { %s112_s30 = sadd.s32 %s475_s11, %s269_s29  ;;  %s107_s2 = scalar_lea.vmem [#allocation2], %s268_s28 }
  0x18   : > { %s116_s3 = sshll.u32 %s107_s2, 4  ;;  %s270_s4 = sshll.u32 %s112_s30, 6  ;;  %s117_s3 = int_to_ptr.vmem [resolvable:$true] %s116_s3 }
  0x19   : > { %s114_s15 = scalar_lea.hbm %s653_s0, %s270_s4  ;;  %p584_p0 = pnand %p291_p13, %p550_p3 }
  0x1a   : > { %p271_p1 = scmp.ge.s32.totalorder %s483_s13, 1  ;;  %p121_p2 = scmp.lt.s32.totalorder %s483_s13, 5 }
  0x1b   : > { %s104_s18 = scalar_lea.sflag [#allocation3], %s103_s26  ;;  %p361_p4 = pneg %p584_p0 }
  0x1c   : > { %s372_s23 = scalar_lea.vmem %s117_s3, 64  ;;  %s485_s24 = smov [#allocation2]  }
  0x1d   : > { %p373_p5 = scmp.ne.s32.totalorder %s117_s3, %s372_s23  ;;  %s377_s28 = sshll.u32 %s485_s24, 4  ;;  %s378_s28 = int_to_ptr.vmem [resolvable:$false] %s377_s28 }
  0x1e   : > { %s379_s29 = scalar_lea.vmem %s378_s28, 128  ;;  %p380_p10 = scmp.lt.s32.totalorder %s117_s3, %s378_s28 }
  0x1f   : > { %p375_p6 = pnand %p373_p5, %p361_p4  ;;  %p381_p11 = scmp.lt.s32.totalorder %s379_s29, %s372_s23 }
  0x21   : > { %p376_p7 = pneg %p375_p6  ;;  %p382_p3 = por %p381_p11, %p380_p10 }
  0x23   : > { %p383_p13 = pnand %p382_p3, %p376_p7 }
  0x25   : > { %386 = shalt.err (!%p383_p13)
}
  0x26   : > { %286 = dma.hbm_to_vmem [thread:$0]  (!%p584_p0), %s114_s15, 64, %s117_s3, %s104_s18  }
  0x27   : > { %p122_p12 = pnand %p271_p1, %p121_p2 }
  0x28   : > { %s599_s20 = sand.u32 (!%p122_p12), 1, %s459_s7  }
  0x29   : > { %125 = sbr.rel (%p122_p12) target bundleno = 92 (0x5c), region = 24  ;;  %s272_s26 = sshll.u32 (!%p122_p12), %s599_s20, 2 }
  0x2a   : > { %s128_s30 = scalar_lea.sflag (!%p122_p12), [#allocation3], %s599_s20  ;;  %s131_s2 = scalar_lea.vmem (!%p122_p12), [#allocation2], %s272_s26 }
  0x2e   : > { %446 = dma.done.wait (%p558_p8), %s128_s30, 64  }
  0x2f   : > { %448 = vsyncadd (%p558_p8), %s128_s30, 4294967232  ;;  %v150_v0 = vld [vmem:[%s131_s2] sm:$0xf]  ;;  %vm152_vm0 = vcmask 1043456   ;;  %s275_s3 = sshll.u32 %s471_s10, 1  ;;  %s149_s5 = scalar_lea.vmem [#allocation5], %s272_s26 }
  0x30   : > { %v151_v1 = vmul.f32 %v150_v0, %v150_v0  ;;  %s175_s4 = sadd.s32 %s467_s9, %s275_s3  ;;  %s179_s21 = sshll.u32 %s149_s5, 4  ;;  %s180_s21 = int_to_ptr.vmem [resolvable:$true] %s179_s21 }
  0x31   : > { %s276_s14 = sshll.u32 %s175_s4, 6  ;;  %s164_s23 = scalar_lea.sflag [#allocation4], %s599_s20 }
  0x32   : > { %v153_v2 = vsel %vm152_vm0, %v151_v1, 0.0  ;;  %s177_s18 = scalar_lea.hbm %s654_s1, %s276_s14  ;;  %s387_s24 = scalar_lea.vmem %s180_s21, 64 }
  0x33   : > { %v154_v3 = vrot.slane %v153_v2, 4  ;;  %p388_p8 = scmp.ne.s32.totalorder %s180_s21, %s387_s24  ;;  %s486_s28 = smov [#allocation5]  }
  0x34   : > { %s391_s10 = sshll.u32 %s486_s28, 4  ;;  %s392_s10 = int_to_ptr.vmem [resolvable:$false] %s391_s10 }
  0x35   : > { %v155_v4 = vadd.f32 %v154_v3, %v153_v2  ;;  %p389_p12 = pnand %p388_p8, %p562_p9  ;;  %s393_s9 = scalar_lea.vmem %s392_s10, 128 }
  0x36   : > { %p394_p1 = scmp.lt.s32.totalorder %s180_s21, %s392_s10  ;;  %p395_p2 = scmp.lt.s32.totalorder %s393_s9, %s387_s24 }
  0x37   : > { %v156_v5 = vrot.slane %v155_v4, 2  ;;  %p390_p0 = pneg %p389_p12 }
  0x38   : > { %p396_p4 = por %p395_p2, %p394_p1 }
  0x39   : > { %v157_v6 = vadd.f32 %v156_v5, %v155_v4 }
  0x3a   : > { %p397_p5 = pnand %p396_p4, %p390_p0 }
  0x3b   : > { %v158_v7 = vrot.slane %v157_v6, 1 }
  0x3d   : > { %v159_v8 = vadd.f32 %v158_v7, %v157_v6 }
  0x3f   : > { %357 = vrsqrt.f32 %v159_v8 }
  0x4c   : > { %v358_v9 = vpop.eup %357 }
  0x4d   : > { %v161_v10 = vmul.f32 %v358_v9, %v150_v0 }
  0x4f   : > { %162 = vst [vmem:[%s149_s5] sm:$0xf] %v161_v10 }
  0x50   : > { %400 = shalt.err (!%p397_p5)
}
  0x51   : > { %s401_s29 = scalar_lea.hbm %s177_s18, 64  ;;  %s405_s30 = scalar_lea.hbm %s654_s1, 256 }
  0x52   : > { %p402_p6 = scmp.ne.s32.totalorder %s177_s18, %s401_s29  ;;  %p406_p11 = scmp.lt.s32.totalorder %s177_s18, %s654_s1 }
  0x53   : > { %p407_p3 = scmp.lt.s32.totalorder %s405_s30, %s401_s29 }
  0x54   : > { %p403_p7 = pnand %p402_p6, %p562_p9 }
  0x55   : > { %p408_p13 = por %p407_p3, %p406_p11 }
  0x56   : > { %p404_p10 = pneg %p403_p7 }
  0x58   : > { %p409_p8 = pnand %p408_p13, %p404_p10 }
  0x5a   : > { %412 = shalt.err (!%p409_p8)
}
  0x5b   : > { %281 = dma.vmem_to_hbm [thread:$0]  (%p562_p9), %s180_s21, 64, %s177_s18, %s164_s23  }
  0x5c PF: > { %p292_p12 = scmp.ge.s32.totalorder %s483_s13, 2  ;;  %s191_s4 = sand.u32 1, %s455_s6  }
  0x5d   : > { %p660_p0 = scmp.ne.s32.totalorder %s658_s25, 0  ;;  %s192_s5 = scalar_lea.sflag [#allocation4], %s191_s4 }
  0x5f   : > { %p288_p1 = pnand %p292_p12, %p660_p0 }
  0x61   : > { %p289_p2 = pneg %p288_p1 }
  0x63   : > { %450 = dma.done.wait (%p289_p2), %s192_s5, 64  }
  0x64   : > { %452 = vsyncadd (%p289_p2), %s192_s5, 4294967232  ;;  %s17_s13 = sadd.s32 1, %s483_s13   ;;  %s661_s6 = smov %s459_s7 }
  0x65   : > { %p14_p4 = scmp.ge.s32.totalorder %s17_s13, 6   ;;  %s662_s7 = smov %s463_s8 }
  0x66   : > { %s663_s8 = smov %s575_s27  ;;  %s664_s9 = smov %s475_s11 }
  0x67   : > { %s665_s10 = smov %s479_s12  ;;  %s666_s11 = smov %s669_s16 }
  0x68   : > { %s667_s12 = smov %s673_s17  ;;  %16 = sbr.rel (!%p14_p4) target bundleno = 7 (0x7), region = 69 }
  0x6d   :  { %197 = vsyncpa [#allocation3], 1 }
  0x6e   :  { %199 = vsyncpa [#allocation3 + $0x1], 1 }
  0x6f   :  { %200 = vsyncpa [#allocation4], 1 }
  0x70   :  { %202 = vsyncpa [#allocation4 + $0x1], 1 }

</bundles_post_ra>
